<compile_context>
chip_gen: v7x
topology: tpu7x:2x2x1
jax: 0.10.0
libtpu: 0.0.40
codegen_flags: <defaults>
</compile_context>

<pallas_src>
import math
import functools

import jax
import jax.numpy as jnp
from jax import lax
from jax.experimental import pallas as pl
from jax.experimental.pallas import tpu as pltpu


def _embedding_ln_kernel(ids_ref, pe_ref, gamma_ref, beta_ref, emb_hbm,
                         out_ref, gbuf, sem, *, scale, eps):
    """One grid step = (one sequence tile, one batch row).

    ids_ref : (B, S)  int32, SMEM (scalar prefetch) -- used only for addressing.
    pe_ref  : (T, D)  f32, VMEM tile of the positional encoding.
    gamma_ref, beta_ref : (1, D) f32, VMEM, resident across all grid steps.
    emb_hbm : (V, D)  f32, raw HBM ref (pl.ANY) -- rows DMA-gathered on demand.
    out_ref : (T, D)  f32 output tile (batch dim squeezed by the BlockSpec).
    gbuf    : (T, D)  f32 VMEM scratch for the gathered embedding rows.
    sem     : (T,)    DMA semaphores, one per gathered row.
    """
    s_blk = pl.program_id(0)
    b = pl.program_id(1)
    seq_tile, _ = gbuf.shape
    vocab = emb_hbm.shape[0]
    s0 = s_blk * seq_tile

    # --- gather: one small row DMA per token, all in flight at once ---------
    # (static unroll; seq_tile is small -- switch to lax.fori_loop for big tiles)
    copies = []
    for t in range(seq_tile):
        row = ids_ref[b, s0 + t]
        row = jnp.clip(row, 0, vocab - 1)   # guard OOB ids (PyTorch would raise)
        cp = pltpu.make_async_copy(emb_hbm.at[row], gbuf.at[t], sem.at[t])
        cp.start()
        copies.append(cp)
    for cp in copies:
        cp.wait()

    # --- embedding * sqrt(dim) + positional encoding -------------------------
    x = gbuf[...] * scale + pe_ref[...]                     # (T, D) f32

    # TODO(synk): dropout is applied as identity (inference / eval mode).

    # --- LayerNorm over the feature dim (eps matches nn.LayerNorm default) ---
    mean = jnp.mean(x, axis=-1, keepdims=True)
    var = jnp.mean(jnp.square(x - mean), axis=-1, keepdims=True)
    x_hat = (x - mean) * lax.rsqrt(var + eps)
    out_ref[...] = (x_hat * gamma_ref[...] + beta_ref[...]).astype(out_ref.dtype)


def transformer_embedding(ids, emb_table, pe, gamma, beta, *, eps=1e-5,
                          seq_tile=8):
    """ids: (B, S) int32; emb_table: (V, D); pe: (max_seq_len, D);
    gamma/beta: (D,). Returns (B, S, D) float32."""
    B, S = ids.shape
    V, D = emb_table.shape
    seq_tile = min(seq_tile, S)
    assert S % seq_tile == 0, "seq_tile must divide the sequence length"
    assert seq_tile % 8 == 0 or seq_tile == S, "(8,128) sublane tiling rule"

    pe_s = pe[:S].astype(jnp.float32)                 # PE[:seq_len] (plain JAX)
    gamma2 = gamma.reshape(1, D).astype(jnp.float32)
    beta2 = beta.reshape(1, D).astype(jnp.float32)
    scale = math.sqrt(D)

    kernel = functools.partial(_embedding_ln_kernel, scale=scale, eps=eps)

    # grid = (sequence tiles, batch); batch is innermost so the PE tile
    # (index_map constant in b) stays resident in VMEM across the inner loop.
    grid = (S // seq_tile, B)
    grid_spec = pltpu.PrefetchScalarGridSpec(
        num_scalar_prefetch=1,                                    # ids -> SMEM
        grid=grid,
        in_specs=[
            pl.BlockSpec((seq_tile, D), lambda s, b, ids: (s, 0)),  # PE tile
            pl.BlockSpec((1, D), lambda s, b, ids: (0, 0)),         # gamma
            pl.BlockSpec((1, D), lambda s, b, ids: (0, 0)),         # beta
            pl.BlockSpec(memory_space=pl.ANY),                      # emb (HBM)
        ],
        out_specs=pl.BlockSpec((None, seq_tile, D),
                               lambda s, b, ids: (b, s, 0)),
        scratch_shapes=[
            pltpu.VMEM((seq_tile, D), jnp.float32),                 # gather buf
            pltpu.SemaphoreType.DMA((seq_tile,)),                   # row sems
        ],
    )
    return pl.pallas_call(
        kernel,
        out_shape=jax.ShapeDtypeStruct((B, S, D), jnp.float32),
        grid_spec=grid_spec,
        compiler_params=pltpu.CompilerParams(
            dimension_semantics=("parallel", "parallel")),
    )(ids.astype(jnp.int32), pe_s, gamma2, beta2,
      emb_table.astype(jnp.float32))


def positional_encoding(max_seq_len, dim):
    """Matches TransformerEmbedding.PositionalEncoding exactly."""
    pos = jnp.arange(max_seq_len, dtype=jnp.float32)[:, None]          # (L, 1)
    div_term = jnp.exp(-jnp.arange(0, dim, 2, dtype=jnp.float32) / dim
                       * math.log(10000.0))                            # (D/2,)
    pe = jnp.zeros((max_seq_len, dim), dtype=jnp.float32)
    pe = pe.at[:, 0::2].set(jnp.sin(pos * div_term))
    pe = pe.at[:, 1::2].set(jnp.cos(pos * div_term))
    return pe


if __name__ == "__main__":
    # Small, deterministic synthetic setup.
    num_vocab = 1000
    dim = 128            # lane-dense feature dim -> unmasked output stores
    PAD = 0
    max_seq_len = 64
    B, S = 2, 16

    key = jax.random.PRNGKey(0)
    k_emb, k_ids = jax.random.split(key)

    # nn.Embedding init ~ N(0, 1); padding_idx row is zeroed.
    emb_table = jax.random.normal(k_emb, (num_vocab, dim), dtype=jnp.float32)
    emb_table = emb_table.at[PAD].set(0.0)

    # nn.LayerNorm default init: weight=1, bias=0.
    gamma = jnp.ones((dim,), dtype=jnp.float32)
    beta = jnp.zeros((dim,), dtype=jnp.float32)

    pe = positional_encoding(max_seq_len, dim)

    ids = jax.random.randint(k_ids, (B, S), 0, num_vocab, dtype=jnp.int32)

    out = transformer_embedding(ids, emb_table, pe, gamma, beta, seq_tile=8)
    jax.block_until_ready(out)

    # Sanity check against a pure-JAX reference of the same math.
    ref = emb_table[ids] * math.sqrt(dim) + pe[:S][None, :, :]
    mean = ref.mean(-1, keepdims=True)
    var = ((ref - mean) ** 2).mean(-1, keepdims=True)
    ref = (ref - mean) / jnp.sqrt(var + 1e-5) * gamma + beta
    assert out.shape == (B, S, dim)
    assert jnp.allclose(out, ref, atol=1e-4, rtol=1e-4), \
        float(jnp.abs(out - ref).max())

    print("KERNEL_OK")
</pallas_src>

<mosaic_0001>
module attributes {stable_mosaic.version = 11 : i64} {
  func.func @_embedding_ln_kernel(%arg0: i32, %arg1: i32, %arg2: memref<2x16xi32, #tpu.memory_space<smem>>, %arg3: memref<8x128xf32, #tpu.memory_space<vmem>>, %arg4: memref<1x128xf32, #tpu.memory_space<vmem>>, %arg5: memref<1x128xf32, #tpu.memory_space<vmem>>, %arg6: memref<1000x128xf32, #tpu.memory_space<any>>, %arg7: memref<1x8x128xf32, #tpu.memory_space<vmem>>, %arg8: memref<8x128xf32, #tpu.memory_space<vmem>>, %arg9: memref<8x!tpu.dma_semaphore, #tpu.memory_space<semaphore_mem>>) attributes {dimension_semantics = [#tpu.dimension_semantics<parallel>, #tpu.dimension_semantics<parallel>], iteration_bounds = array<i64: 2, 2>, scalar_prefetch = 1 : i64, scratch_operands = 2 : i64, tpu.core_type = #tpu.core_type<tc>, window_params = [{transform_indices = @transform_0, window_bounds = array<i64: 8, 128>}, {pipeline_mode = #tpu.pipeline_mode<synchronous>, transform_indices = @transform_1, window_bounds = array<i64: 1, 128>}, {pipeline_mode = #tpu.pipeline_mode<synchronous>, transform_indices = @transform_2, window_bounds = array<i64: 1, 128>}, {}, {transform_indices = @transform_4, window_bounds = array<i64: 1, 8, 128>}]} {
    %c8_i32 = arith.constant 8 : i32
    %0 = arith.muli %arg0, %c8_i32 : i32
    %c0_i32 = arith.constant 0 : i32
    %1 = arith.addi %0, %c0_i32 : i32
    %2 = arith.index_cast %arg1 : i32 to index
    %3 = arith.index_cast %1 : i32 to index
    %4 = memref.load %arg2[%2, %3] : memref<2x16xi32, #tpu.memory_space<smem>>
    %c0_i32_0 = arith.constant 0 : i32
    %c999_i32 = arith.constant 999 : i32
    %5 = arith.maxsi %c0_i32_0, %4 : i32
    %6 = arith.minsi %c999_i32, %5 : i32
    %c0_i32_1 = arith.constant 0 : i32
    %c0_i32_2 = arith.constant 0 : i32
    %c0_i32_3 = arith.constant 0 : i32
    %7 = tpu.memref_slice %arg6[%6, %c0_i32_3] : memref<1000x128xf32, #tpu.memory_space<any>> -> memref<1x128xf32, #tpu.memory_space<any>>
    %8 = tpu.memref_squeeze %7 : memref<1x128xf32, #tpu.memory_space<any>> -> memref<128xf32, #tpu.memory_space<any>>
    %c0_i32_4 = arith.constant 0 : i32
    %9 = tpu.memref_slice %arg8[%c0_i32_1, %c0_i32_4] : memref<8x128xf32, #tpu.memory_space<vmem>> -> memref<1x128xf32, #tpu.memory_space<vmem>>
    %10 = tpu.memref_squeeze %9 : memref<1x128xf32, #tpu.memory_space<vmem>> -> memref<128xf32, #tpu.memory_space<vmem>>
    %11 = tpu.memref_slice %arg9[%c0_i32_2] : memref<8x!tpu.dma_semaphore, #tpu.memory_space<semaphore_mem>> -> memref<1x!tpu.dma_semaphore, #tpu.memory_space<semaphore_mem>>
    %12 = tpu.memref_squeeze %11 : memref<1x!tpu.dma_semaphore, #tpu.memory_space<semaphore_mem>> -> memref<!tpu.dma_semaphore, #tpu.memory_space<semaphore_mem>>
    tpu.enqueue_dma source(%8 : memref<128xf32, #tpu.memory_space<any>>) target(%10 : memref<128xf32, #tpu.memory_space<vmem>>) target_semaphore(%12 : memref<!tpu.dma_semaphore, #tpu.memory_space<semaphore_mem>>)
    %c1_i32 = arith.constant 1 : i32
    %13 = arith.addi %0, %c1_i32 : i32
    %14 = arith.index_cast %arg1 : i32 to index
    %15 = arith.index_cast %13 : i32 to index
    %16 = memref.load %arg2[%14, %15] : memref<2x16xi32, #tpu.memory_space<smem>>
    %c0_i32_5 = arith.constant 0 : i32
    %c999_i32_6 = arith.constant 999 : i32
    %17 = arith.maxsi %c0_i32_5, %16 : i32
    %18 = arith.minsi %c999_i32_6, %17 : i32
    %c1_i32_7 = arith.constant 1 : i32
    %c1_i32_8 = arith.constant 1 : i32
    %c0_i32_9 = arith.constant 0 : i32
    %19 = tpu.memref_slice %arg6[%18, %c0_i32_9] : memref<1000x128xf32, #tpu.memory_space<any>> -> memref<1x128xf32, #tpu.memory_space<any>>
    %20 = tpu.memref_squeeze %19 : memref<1x128xf32, #tpu.memory_space<any>> -> memref<128xf32, #tpu.memory_space<any>>
    %c0_i32_10 = arith.constant 0 : i32
    %21 = tpu.memref_slice %arg8[%c1_i32_7, %c0_i32_10] : memref<8x128xf32, #tpu.memory_space<vmem>> -> memref<1x128xf32, #tpu.memory_space<vmem>>
    %22 = tpu.memref_squeeze %21 : memref<1x128xf32, #tpu.memory_space<vmem>> -> memref<128xf32, #tpu.memory_space<vmem>>
    %23 = tpu.memref_slice %arg9[%c1_i32_8] : memref<8x!tpu.dma_semaphore, #tpu.memory_space<semaphore_mem>> -> memref<1x!tpu.dma_semaphore, #tpu.memory_space<semaphore_mem>>
    %24 = tpu.memref_squeeze %23 : memref<1x!tpu.dma_semaphore, #tpu.memory_space<semaphore_mem>> -> memref<!tpu.dma_semaphore, #tpu.memory_space<semaphore_mem>>
    tpu.enqueue_dma source(%20 : memref<128xf32, #tpu.memory_space<any>>) target(%22 : memref<128xf32, #tpu.memory_space<vmem>>) target_semaphore(%24 : memref<!tpu.dma_semaphore, #tpu.memory_space<semaphore_mem>>)
    %c2_i32 = arith.constant 2 : i32
    %25 = arith.addi %0, %c2_i32 : i32
    %26 = arith.index_cast %arg1 : i32 to index
    %27 = arith.index_cast %25 : i32 to index
    %28 = memref.load %arg2[%26, %27] : memref<2x16xi32, #tpu.memory_space<smem>>
    %c0_i32_11 = arith.constant 0 : i32
    %c999_i32_12 = arith.constant 999 : i32
    %29 = arith.maxsi %c0_i32_11, %28 : i32
    %30 = arith.minsi %c999_i32_12, %29 : i32
    %c2_i32_13 = arith.constant 2 : i32
    %c2_i32_14 = arith.constant 2 : i32
    %c0_i32_15 = arith.constant 0 : i32
    %31 = tpu.memref_slice %arg6[%30, %c0_i32_15] : memref<1000x128xf32, #tpu.memory_space<any>> -> memref<1x128xf32, #tpu.memory_space<any>>
    %32 = tpu.memref_squeeze %31 : memref<1x128xf32, #tpu.memory_space<any>> -> memref<128xf32, #tpu.memory_space<any>>
    %c0_i32_16 = arith.constant 0 : i32
    %33 = tpu.memref_slice %arg8[%c2_i32_13, %c0_i32_16] : memref<8x128xf32, #tpu.memory_space<vmem>> -> memref<1x128xf32, #tpu.memory_space<vmem>>
    %34 = tpu.memref_squeeze %33 : memref<1x128xf32, #tpu.memory_space<vmem>> -> memref<128xf32, #tpu.memory_space<vmem>>
    %35 = tpu.memref_slice %arg9[%c2_i32_14] : memref<8x!tpu.dma_semaphore, #tpu.memory_space<semaphore_mem>> -> memref<1x!tpu.dma_semaphore, #tpu.memory_space<semaphore_mem>>
    %36 = tpu.memref_squeeze %35 : memref<1x!tpu.dma_semaphore, #tpu.memory_space<semaphore_mem>> -> memref<!tpu.dma_semaphore, #tpu.memory_space<semaphore_mem>>
    tpu.enqueue_dma source(%32 : memref<128xf32, #tpu.memory_space<any>>) target(%34 : memref<128xf32, #tpu.memory_space<vmem>>) target_semaphore(%36 : memref<!tpu.dma_semaphore, #tpu.memory_space<semaphore_mem>>)
    %c3_i32 = arith.constant 3 : i32
    %37 = arith.addi %0, %c3_i32 : i32
    %38 = arith.index_cast %arg1 : i32 to index
    %39 = arith.index_cast %37 : i32 to index
    %40 = memref.load %arg2[%38, %39] : memref<2x16xi32, #tpu.memory_space<smem>>
    %c0_i32_17 = arith.constant 0 : i32
    %c999_i32_18 = arith.constant 999 : i32
    %41 = arith.maxsi %c0_i32_17, %40 : i32
    %42 = arith.minsi %c999_i32_18, %41 : i32
    %c3_i32_19 = arith.constant 3 : i32
    %c3_i32_20 = arith.constant 3 : i32
    %c0_i32_21 = arith.constant 0 : i32
    %43 = tpu.memref_slice %arg6[%42, %c0_i32_21] : memref<1000x128xf32, #tpu.memory_space<any>> -> memref<1x128xf32, #tpu.memory_space<any>>
    %44 = tpu.memref_squeeze %43 : memref<1x128xf32, #tpu.memory_space<any>> -> memref<128xf32, #tpu.memory_space<any>>
    %c0_i32_22 = arith.constant 0 : i32
    %45 = tpu.memref_slice %arg8[%c3_i32_19, %c0_i32_22] : memref<8x128xf32, #tpu.memory_space<vmem>> -> memref<1x128xf32, #tpu.memory_space<vmem>>
    %46 = tpu.memref_squeeze %45 : memref<1x128xf32, #tpu.memory_space<vmem>> -> memref<128xf32, #tpu.memory_space<vmem>>
    %47 = tpu.memref_slice %arg9[%c3_i32_20] : memref<8x!tpu.dma_semaphore, #tpu.memory_space<semaphore_mem>> -> memref<1x!tpu.dma_semaphore, #tpu.memory_space<semaphore_mem>>
    %48 = tpu.memref_squeeze %47 : memref<1x!tpu.dma_semaphore, #tpu.memory_space<semaphore_mem>> -> memref<!tpu.dma_semaphore, #tpu.memory_space<semaphore_mem>>
    tpu.enqueue_dma source(%44 : memref<128xf32, #tpu.memory_space<any>>) target(%46 : memref<128xf32, #tpu.memory_space<vmem>>) target_semaphore(%48 : memref<!tpu.dma_semaphore, #tpu.memory_space<semaphore_mem>>)
    %c4_i32 = arith.constant 4 : i32
    %49 = arith.addi %0, %c4_i32 : i32
    %50 = arith.index_cast %arg1 : i32 to index
    %51 = arith.index_cast %49 : i32 to index
    %52 = memref.load %arg2[%50, %51] : memref<2x16xi32, #tpu.memory_space<smem>>
    %c0_i32_23 = arith.constant 0 : i32
    %c999_i32_24 = arith.constant 999 : i32
    %53 = arith.maxsi %c0_i32_23, %52 : i32
    %54 = arith.minsi %c999_i32_24, %53 : i32
    %c4_i32_25 = arith.constant 4 : i32
    %c4_i32_26 = arith.constant 4 : i32
    %c0_i32_27 = arith.constant 0 : i32
    %55 = tpu.memref_slice %arg6[%54, %c0_i32_27] : memref<1000x128xf32, #tpu.memory_space<any>> -> memref<1x128xf32, #tpu.memory_space<any>>
    %56 = tpu.memref_squeeze %55 : memref<1x128xf32, #tpu.memory_space<any>> -> memref<128xf32, #tpu.memory_space<any>>
    %c0_i32_28 = arith.constant 0 : i32
    %57 = tpu.memref_slice %arg8[%c4_i32_25, %c0_i32_28] : memref<8x128xf32, #tpu.memory_space<vmem>> -> memref<1x128xf32, #tpu.memory_space<vmem>>
    %58 = tpu.memref_squeeze %57 : memref<1x128xf32, #tpu.memory_space<vmem>> -> memref<128xf32, #tpu.memory_space<vmem>>
    %59 = tpu.memref_slice %arg9[%c4_i32_26] : memref<8x!tpu.dma_semaphore, #tpu.memory_space<semaphore_mem>> -> memref<1x!tpu.dma_semaphore, #tpu.memory_space<semaphore_mem>>
    %60 = tpu.memref_squeeze %59 : memref<1x!tpu.dma_semaphore, #tpu.memory_space<semaphore_mem>> -> memref<!tpu.dma_semaphore, #tpu.memory_space<semaphore_mem>>
    tpu.enqueue_dma source(%56 : memref<128xf32, #tpu.memory_space<any>>) target(%58 : memref<128xf32, #tpu.memory_space<vmem>>) target_semaphore(%60 : memref<!tpu.dma_semaphore, #tpu.memory_space<semaphore_mem>>)
    %c5_i32 = arith.constant 5 : i32
    %61 = arith.addi %0, %c5_i32 : i32
    %62 = arith.index_cast %arg1 : i32 to index
    %63 = arith.index_cast %61 : i32 to index
    %64 = memref.load %arg2[%62, %63] : memref<2x16xi32, #tpu.memory_space<smem>>
    %c0_i32_29 = arith.constant 0 : i32
    %c999_i32_30 = arith.constant 999 : i32
    %65 = arith.maxsi %c0_i32_29, %64 : i32
    %66 = arith.minsi %c999_i32_30, %65 : i32
    %c5_i32_31 = arith.constant 5 : i32
    %c5_i32_32 = arith.constant 5 : i32
    %c0_i32_33 = arith.constant 0 : i32
    %67 = tpu.memref_slice %arg6[%66, %c0_i32_33] : memref<1000x128xf32, #tpu.memory_space<any>> -> memref<1x128xf32, #tpu.memory_space<any>>
    %68 = tpu.memref_squeeze %67 : memref<1x128xf32, #tpu.memory_space<any>> -> memref<128xf32, #tpu.memory_space<any>>
    %c0_i32_34 = arith.constant 0 : i32
    %69 = tpu.memref_slice %arg8[%c5_i32_31, %c0_i32_34] : memref<8x128xf32, #tpu.memory_space<vmem>> -> memref<1x128xf32, #tpu.memory_space<vmem>>
    %70 = tpu.memref_squeeze %69 : memref<1x128xf32, #tpu.memory_space<vmem>> -> memref<128xf32, #tpu.memory_space<vmem>>
    %71 = tpu.memref_slice %arg9[%c5_i32_32] : memref<8x!tpu.dma_semaphore, #tpu.memory_space<semaphore_mem>> -> memref<1x!tpu.dma_semaphore, #tpu.memory_space<semaphore_mem>>
    %72 = tpu.memref_squeeze %71 : memref<1x!tpu.dma_semaphore, #tpu.memory_space<semaphore_mem>> -> memref<!tpu.dma_semaphore, #tpu.memory_space<semaphore_mem>>
    tpu.enqueue_dma source(%68 : memref<128xf32, #tpu.memory_space<any>>) target(%70 : memref<128xf32, #tpu.memory_space<vmem>>) target_semaphore(%72 : memref<!tpu.dma_semaphore, #tpu.memory_space<semaphore_mem>>)
    %c6_i32 = arith.constant 6 : i32
    %73 = arith.addi %0, %c6_i32 : i32
    %74 = arith.index_cast %arg1 : i32 to index
    %75 = arith.index_cast %73 : i32 to index
    %76 = memref.load %arg2[%74, %75] : memref<2x16xi32, #tpu.memory_space<smem>>
    %c0_i32_35 = arith.constant 0 : i32
    %c999_i32_36 = arith.constant 999 : i32
    %77 = arith.maxsi %c0_i32_35, %76 : i32
    %78 = arith.minsi %c999_i32_36, %77 : i32
    %c6_i32_37 = arith.constant 6 : i32
    %c6_i32_38 = arith.constant 6 : i32
    %c0_i32_39 = arith.constant 0 : i32
    %79 = tpu.memref_slice %arg6[%78, %c0_i32_39] : memref<1000x128xf32, #tpu.memory_space<any>> -> memref<1x128xf32, #tpu.memory_space<any>>
    %80 = tpu.memref_squeeze %79 : memref<1x128xf32, #tpu.memory_space<any>> -> memref<128xf32, #tpu.memory_space<any>>
    %c0_i32_40 = arith.constant 0 : i32
    %81 = tpu.memref_slice %arg8[%c6_i32_37, %c0_i32_40] : memref<8x128xf32, #tpu.memory_space<vmem>> -> memref<1x128xf32, #tpu.memory_space<vmem>>
    %82 = tpu.memref_squeeze %81 : memref<1x128xf32, #tpu.memory_space<vmem>> -> memref<128xf32, #tpu.memory_space<vmem>>
    %83 = tpu.memref_slice %arg9[%c6_i32_38] : memref<8x!tpu.dma_semaphore, #tpu.memory_space<semaphore_mem>> -> memref<1x!tpu.dma_semaphore, #tpu.memory_space<semaphore_mem>>
    %84 = tpu.memref_squeeze %83 : memref<1x!tpu.dma_semaphore, #tpu.memory_space<semaphore_mem>> -> memref<!tpu.dma_semaphore, #tpu.memory_space<semaphore_mem>>
    tpu.enqueue_dma source(%80 : memref<128xf32, #tpu.memory_space<any>>) target(%82 : memref<128xf32, #tpu.memory_space<vmem>>) target_semaphore(%84 : memref<!tpu.dma_semaphore, #tpu.memory_space<semaphore_mem>>)
    %c7_i32 = arith.constant 7 : i32
    %85 = arith.addi %0, %c7_i32 : i32
    %86 = arith.index_cast %arg1 : i32 to index
    %87 = arith.index_cast %85 : i32 to index
    %88 = memref.load %arg2[%86, %87] : memref<2x16xi32, #tpu.memory_space<smem>>
    %c0_i32_41 = arith.constant 0 : i32
    %c999_i32_42 = arith.constant 999 : i32
    %89 = arith.maxsi %c0_i32_41, %88 : i32
    %90 = arith.minsi %c999_i32_42, %89 : i32
    %c7_i32_43 = arith.constant 7 : i32
    %c7_i32_44 = arith.constant 7 : i32
    %c0_i32_45 = arith.constant 0 : i32
    %91 = tpu.memref_slice %arg6[%90, %c0_i32_45] : memref<1000x128xf32, #tpu.memory_space<any>> -> memref<1x128xf32, #tpu.memory_space<any>>
    %92 = tpu.memref_squeeze %91 : memref<1x128xf32, #tpu.memory_space<any>> -> memref<128xf32, #tpu.memory_space<any>>
    %c0_i32_46 = arith.constant 0 : i32
    %93 = tpu.memref_slice %arg8[%c7_i32_43, %c0_i32_46] : memref<8x128xf32, #tpu.memory_space<vmem>> -> memref<1x128xf32, #tpu.memory_space<vmem>>
    %94 = tpu.memref_squeeze %93 : memref<1x128xf32, #tpu.memory_space<vmem>> -> memref<128xf32, #tpu.memory_space<vmem>>
    %95 = tpu.memref_slice %arg9[%c7_i32_44] : memref<8x!tpu.dma_semaphore, #tpu.memory_space<semaphore_mem>> -> memref<1x!tpu.dma_semaphore, #tpu.memory_space<semaphore_mem>>
    %96 = tpu.memref_squeeze %95 : memref<1x!tpu.dma_semaphore, #tpu.memory_space<semaphore_mem>> -> memref<!tpu.dma_semaphore, #tpu.memory_space<semaphore_mem>>
    tpu.enqueue_dma source(%92 : memref<128xf32, #tpu.memory_space<any>>) target(%94 : memref<128xf32, #tpu.memory_space<vmem>>) target_semaphore(%96 : memref<!tpu.dma_semaphore, #tpu.memory_space<semaphore_mem>>)
    %c0_i32_47 = arith.constant 0 : i32
    %c0_i32_48 = arith.constant 0 : i32
    %c0_i32_49 = arith.constant 0 : i32
    %97 = tpu.memref_slice %arg6[%6, %c0_i32_49] : memref<1000x128xf32, #tpu.memory_space<any>> -> memref<1x128xf32, #tpu.memory_space<any>>
    %98 = tpu.memref_squeeze %97 : memref<1x128xf32, #tpu.memory_space<any>> -> memref<128xf32, #tpu.memory_space<any>>
    %c0_i32_50 = arith.constant 0 : i32
    %99 = tpu.memref_slice %arg8[%c0_i32_47, %c0_i32_50] : memref<8x128xf32, #tpu.memory_space<vmem>> -> memref<1x128xf32, #tpu.memory_space<vmem>>
    %100 = tpu.memref_squeeze %99 : memref<1x128xf32, #tpu.memory_space<vmem>> -> memref<128xf32, #tpu.memory_space<vmem>>
    %101 = tpu.memref_slice %arg9[%c0_i32_48] : memref<8x!tpu.dma_semaphore, #tpu.memory_space<semaphore_mem>> -> memref<1x!tpu.dma_semaphore, #tpu.memory_space<semaphore_mem>>
    %102 = tpu.memref_squeeze %101 : memref<1x!tpu.dma_semaphore, #tpu.memory_space<semaphore_mem>> -> memref<!tpu.dma_semaphore, #tpu.memory_space<semaphore_mem>>
    tpu.wait_dma2 semaphore(%102 : memref<!tpu.dma_semaphore, #tpu.memory_space<semaphore_mem>>) src(%98 : memref<128xf32, #tpu.memory_space<any>>) dst(%100 : memref<128xf32, #tpu.memory_space<vmem>>)
    %c1_i32_51 = arith.constant 1 : i32
    %c1_i32_52 = arith.constant 1 : i32
    %c0_i32_53 = arith.constant 0 : i32
    %103 = tpu.memref_slice %arg6[%18, %c0_i32_53] : memref<1000x128xf32, #tpu.memory_space<any>> -> memref<1x128xf32, #tpu.memory_space<any>>
    %104 = tpu.memref_squeeze %103 : memref<1x128xf32, #tpu.memory_space<any>> -> memref<128xf32, #tpu.memory_space<any>>
    %c0_i32_54 = arith.constant 0 : i32
    %105 = tpu.memref_slice %arg8[%c1_i32_51, %c0_i32_54] : memref<8x128xf32, #tpu.memory_space<vmem>> -> memref<1x128xf32, #tpu.memory_space<vmem>>
    %106 = tpu.memref_squeeze %105 : memref<1x128xf32, #tpu.memory_space<vmem>> -> memref<128xf32, #tpu.memory_space<vmem>>
    %107 = tpu.memref_slice %arg9[%c1_i32_52] : memref<8x!tpu.dma_semaphore, #tpu.memory_space<semaphore_mem>> -> memref<1x!tpu.dma_semaphore, #tpu.memory_space<semaphore_mem>>
    %108 = tpu.memref_squeeze %107 : memref<1x!tpu.dma_semaphore, #tpu.memory_space<semaphore_mem>> -> memref<!tpu.dma_semaphore, #tpu.memory_space<semaphore_mem>>
    tpu.wait_dma2 semaphore(%108 : memref<!tpu.dma_semaphore, #tpu.memory_space<semaphore_mem>>) src(%104 : memref<128xf32, #tpu.memory_space<any>>) dst(%106 : memref<128xf32, #tpu.memory_space<vmem>>)
    %c2_i32_55 = arith.constant 2 : i32
    %c2_i32_56 = arith.constant 2 : i32
    %c0_i32_57 = arith.constant 0 : i32
    %109 = tpu.memref_slice %arg6[%30, %c0_i32_57] : memref<1000x128xf32, #tpu.memory_space<any>> -> memref<1x128xf32, #tpu.memory_space<any>>
    %110 = tpu.memref_squeeze %109 : memref<1x128xf32, #tpu.memory_space<any>> -> memref<128xf32, #tpu.memory_space<any>>
    %c0_i32_58 = arith.constant 0 : i32
    %111 = tpu.memref_slice %arg8[%c2_i32_55, %c0_i32_58] : memref<8x128xf32, #tpu.memory_space<vmem>> -> memref<1x128xf32, #tpu.memory_space<vmem>>
    %112 = tpu.memref_squeeze %111 : memref<1x128xf32, #tpu.memory_space<vmem>> -> memref<128xf32, #tpu.memory_space<vmem>>
    %113 = tpu.memref_slice %arg9[%c2_i32_56] : memref<8x!tpu.dma_semaphore, #tpu.memory_space<semaphore_mem>> -> memref<1x!tpu.dma_semaphore, #tpu.memory_space<semaphore_mem>>
    %114 = tpu.memref_squeeze %113 : memref<1x!tpu.dma_semaphore, #tpu.memory_space<semaphore_mem>> -> memref<!tpu.dma_semaphore, #tpu.memory_space<semaphore_mem>>
    tpu.wait_dma2 semaphore(%114 : memref<!tpu.dma_semaphore, #tpu.memory_space<semaphore_mem>>) src(%110 : memref<128xf32, #tpu.memory_space<any>>) dst(%112 : memref<128xf32, #tpu.memory_space<vmem>>)
    %c3_i32_59 = arith.constant 3 : i32
    %c3_i32_60 = arith.constant 3 : i32
    %c0_i32_61 = arith.constant 0 : i32
    %115 = tpu.memref_slice %arg6[%42, %c0_i32_61] : memref<1000x128xf32, #tpu.memory_space<any>> -> memref<1x128xf32, #tpu.memory_space<any>>
    %116 = tpu.memref_squeeze %115 : memref<1x128xf32, #tpu.memory_space<any>> -> memref<128xf32, #tpu.memory_space<any>>
    %c0_i32_62 = arith.constant 0 : i32
    %117 = tpu.memref_slice %arg8[%c3_i32_59, %c0_i32_62] : memref<8x128xf32, #tpu.memory_space<vmem>> -> memref<1x128xf32, #tpu.memory_space<vmem>>
    %118 = tpu.memref_squeeze %117 : memref<1x128xf32, #tpu.memory_space<vmem>> -> memref<128xf32, #tpu.memory_space<vmem>>
    %119 = tpu.memref_slice %arg9[%c3_i32_60] : memref<8x!tpu.dma_semaphore, #tpu.memory_space<semaphore_mem>> -> memref<1x!tpu.dma_semaphore, #tpu.memory_space<semaphore_mem>>
    %120 = tpu.memref_squeeze %119 : memref<1x!tpu.dma_semaphore, #tpu.memory_space<semaphore_mem>> -> memref<!tpu.dma_semaphore, #tpu.memory_space<semaphore_mem>>
    tpu.wait_dma2 semaphore(%120 : memref<!tpu.dma_semaphore, #tpu.memory_space<semaphore_mem>>) src(%116 : memref<128xf32, #tpu.memory_space<any>>) dst(%118 : memref<128xf32, #tpu.memory_space<vmem>>)
    %c4_i32_63 = arith.constant 4 : i32
    %c4_i32_64 = arith.constant 4 : i32
    %c0_i32_65 = arith.constant 0 : i32
    %121 = tpu.memref_slice %arg6[%54, %c0_i32_65] : memref<1000x128xf32, #tpu.memory_space<any>> -> memref<1x128xf32, #tpu.memory_space<any>>
    %122 = tpu.memref_squeeze %121 : memref<1x128xf32, #tpu.memory_space<any>> -> memref<128xf32, #tpu.memory_space<any>>
    %c0_i32_66 = arith.constant 0 : i32
    %123 = tpu.memref_slice %arg8[%c4_i32_63, %c0_i32_66] : memref<8x128xf32, #tpu.memory_space<vmem>> -> memref<1x128xf32, #tpu.memory_space<vmem>>
    %124 = tpu.memref_squeeze %123 : memref<1x128xf32, #tpu.memory_space<vmem>> -> memref<128xf32, #tpu.memory_space<vmem>>
    %125 = tpu.memref_slice %arg9[%c4_i32_64] : memref<8x!tpu.dma_semaphore, #tpu.memory_space<semaphore_mem>> -> memref<1x!tpu.dma_semaphore, #tpu.memory_space<semaphore_mem>>
    %126 = tpu.memref_squeeze %125 : memref<1x!tpu.dma_semaphore, #tpu.memory_space<semaphore_mem>> -> memref<!tpu.dma_semaphore, #tpu.memory_space<semaphore_mem>>
    tpu.wait_dma2 semaphore(%126 : memref<!tpu.dma_semaphore, #tpu.memory_space<semaphore_mem>>) src(%122 : memref<128xf32, #tpu.memory_space<any>>) dst(%124 : memref<128xf32, #tpu.memory_space<vmem>>)
    %c5_i32_67 = arith.constant 5 : i32
    %c5_i32_68 = arith.constant 5 : i32
    %c0_i32_69 = arith.constant 0 : i32
    %127 = tpu.memref_slice %arg6[%66, %c0_i32_69] : memref<1000x128xf32, #tpu.memory_space<any>> -> memref<1x128xf32, #tpu.memory_space<any>>
    %128 = tpu.memref_squeeze %127 : memref<1x128xf32, #tpu.memory_space<any>> -> memref<128xf32, #tpu.memory_space<any>>
    %c0_i32_70 = arith.constant 0 : i32
    %129 = tpu.memref_slice %arg8[%c5_i32_67, %c0_i32_70] : memref<8x128xf32, #tpu.memory_space<vmem>> -> memref<1x128xf32, #tpu.memory_space<vmem>>
    %130 = tpu.memref_squeeze %129 : memref<1x128xf32, #tpu.memory_space<vmem>> -> memref<128xf32, #tpu.memory_space<vmem>>
    %131 = tpu.memref_slice %arg9[%c5_i32_68] : memref<8x!tpu.dma_semaphore, #tpu.memory_space<semaphore_mem>> -> memref<1x!tpu.dma_semaphore, #tpu.memory_space<semaphore_mem>>
    %132 = tpu.memref_squeeze %131 : memref<1x!tpu.dma_semaphore, #tpu.memory_space<semaphore_mem>> -> memref<!tpu.dma_semaphore, #tpu.memory_space<semaphore_mem>>
    tpu.wait_dma2 semaphore(%132 : memref<!tpu.dma_semaphore, #tpu.memory_space<semaphore_mem>>) src(%128 : memref<128xf32, #tpu.memory_space<any>>) dst(%130 : memref<128xf32, #tpu.memory_space<vmem>>)
    %c6_i32_71 = arith.constant 6 : i32
    %c6_i32_72 = arith.constant 6 : i32
    %c0_i32_73 = arith.constant 0 : i32
    %133 = tpu.memref_slice %arg6[%78, %c0_i32_73] : memref<1000x128xf32, #tpu.memory_space<any>> -> memref<1x128xf32, #tpu.memory_space<any>>
    %134 = tpu.memref_squeeze %133 : memref<1x128xf32, #tpu.memory_space<any>> -> memref<128xf32, #tpu.memory_space<any>>
    %c0_i32_74 = arith.constant 0 : i32
    %135 = tpu.memref_slice %arg8[%c6_i32_71, %c0_i32_74] : memref<8x128xf32, #tpu.memory_space<vmem>> -> memref<1x128xf32, #tpu.memory_space<vmem>>
    %136 = tpu.memref_squeeze %135 : memref<1x128xf32, #tpu.memory_space<vmem>> -> memref<128xf32, #tpu.memory_space<vmem>>
    %137 = tpu.memref_slice %arg9[%c6_i32_72] : memref<8x!tpu.dma_semaphore, #tpu.memory_space<semaphore_mem>> -> memref<1x!tpu.dma_semaphore, #tpu.memory_space<semaphore_mem>>
    %138 = tpu.memref_squeeze %137 : memref<1x!tpu.dma_semaphore, #tpu.memory_space<semaphore_mem>> -> memref<!tpu.dma_semaphore, #tpu.memory_space<semaphore_mem>>
    tpu.wait_dma2 semaphore(%138 : memref<!tpu.dma_semaphore, #tpu.memory_space<semaphore_mem>>) src(%134 : memref<128xf32, #tpu.memory_space<any>>) dst(%136 : memref<128xf32, #tpu.memory_space<vmem>>)
    %c7_i32_75 = arith.constant 7 : i32
    %c7_i32_76 = arith.constant 7 : i32
    %c0_i32_77 = arith.constant 0 : i32
    %139 = tpu.memref_slice %arg6[%90, %c0_i32_77] : memref<1000x128xf32, #tpu.memory_space<any>> -> memref<1x128xf32, #tpu.memory_space<any>>
    %140 = tpu.memref_squeeze %139 : memref<1x128xf32, #tpu.memory_space<any>> -> memref<128xf32, #tpu.memory_space<any>>
    %c0_i32_78 = arith.constant 0 : i32
    %141 = tpu.memref_slice %arg8[%c7_i32_75, %c0_i32_78] : memref<8x128xf32, #tpu.memory_space<vmem>> -> memref<1x128xf32, #tpu.memory_space<vmem>>
    %142 = tpu.memref_squeeze %141 : memref<1x128xf32, #tpu.memory_space<vmem>> -> memref<128xf32, #tpu.memory_space<vmem>>
    %143 = tpu.memref_slice %arg9[%c7_i32_76] : memref<8x!tpu.dma_semaphore, #tpu.memory_space<semaphore_mem>> -> memref<1x!tpu.dma_semaphore, #tpu.memory_space<semaphore_mem>>
    %144 = tpu.memref_squeeze %143 : memref<1x!tpu.dma_semaphore, #tpu.memory_space<semaphore_mem>> -> memref<!tpu.dma_semaphore, #tpu.memory_space<semaphore_mem>>
    tpu.wait_dma2 semaphore(%144 : memref<!tpu.dma_semaphore, #tpu.memory_space<semaphore_mem>>) src(%140 : memref<128xf32, #tpu.memory_space<any>>) dst(%142 : memref<128xf32, #tpu.memory_space<vmem>>)
    %c0 = arith.constant 0 : index
    %c0_79 = arith.constant 0 : index
    %145 = vector.load %arg8[%c0, %c0_79] : memref<8x128xf32, #tpu.memory_space<vmem>>, vector<8x128xf32>
    %cst = arith.constant 11.3137083 : f32
    %146 = vector.broadcast %cst : f32 to vector<8x128xf32>
    %147 = arith.mulf %145, %146 : vector<8x128xf32>
    %c0_80 = arith.constant 0 : index
    %c0_81 = arith.constant 0 : index
    %148 = vector.load %arg3[%c0_80, %c0_81] : memref<8x128xf32, #tpu.memory_space<vmem>>, vector<8x128xf32>
    %149 = arith.addf %147, %148 : vector<8x128xf32>
    %cst_82 = arith.constant dense<0.000000e+00> : vector<8xf32>
    %150 = vector.multi_reduction <add>, %149, %cst_82 [1] : vector<8x128xf32> to vector<8xf32>
    %151 = vector.shape_cast %150 : vector<8xf32> to vector<8x1xf32>
    %cst_83 = arith.constant 1.280000e+02 : f32
    %152 = vector.broadcast %cst_83 : f32 to vector<8x1xf32>
    %153 = arith.divf %151, %152 : vector<8x1xf32>
    %154 = vector.broadcast %153 : vector<8x1xf32> to vector<8x128xf32>
    %155 = arith.subf %149, %154 : vector<8x128xf32>
    %156 = arith.mulf %155, %155 : vector<8x128xf32>
    %cst_84 = arith.constant dense<0.000000e+00> : vector<8xf32>
    %157 = vector.multi_reduction <add>, %156, %cst_84 [1] : vector<8x128xf32> to vector<8xf32>
    %158 = vector.shape_cast %157 : vector<8xf32> to vector<8x1xf32>
    %cst_85 = arith.constant 1.280000e+02 : f32
    %159 = vector.broadcast %cst_85 : f32 to vector<8x1xf32>
    %160 = arith.divf %158, %159 : vector<8x1xf32>
    %161 = vector.broadcast %153 : vector<8x1xf32> to vector<8x128xf32>
    %162 = arith.subf %149, %161 : vector<8x128xf32>
    %cst_86 = arith.constant 9.99999974E-6 : f32
    %163 = vector.broadcast %cst_86 : f32 to vector<8x1xf32>
    %164 = arith.addf %160, %163 : vector<8x1xf32>
    %165 = math.rsqrt %164 : vector<8x1xf32>
    %166 = vector.broadcast %165 : vector<8x1xf32> to vector<8x128xf32>
    %167 = arith.mulf %162, %166 : vector<8x128xf32>
    %c0_87 = arith.constant 0 : index
    %c0_88 = arith.constant 0 : index
    %168 = vector.load %arg4[%c0_87, %c0_88] : memref<1x128xf32, #tpu.memory_space<vmem>>, vector<1x128xf32>
    %169 = vector.broadcast %168 : vector<1x128xf32> to vector<8x128xf32>
    %170 = arith.mulf %167, %169 : vector<8x128xf32>
    %c0_89 = arith.constant 0 : index
    %c0_90 = arith.constant 0 : index
    %171 = vector.load %arg5[%c0_89, %c0_90] : memref<1x128xf32, #tpu.memory_space<vmem>>, vector<1x128xf32>
    %172 = vector.broadcast %171 : vector<1x128xf32> to vector<8x128xf32>
    %173 = arith.addf %170, %172 : vector<8x128xf32>
    %c0_91 = arith.constant 0 : index
    %c0_92 = arith.constant 0 : index
    %c0_93 = arith.constant 0 : index
    %174 = vector.load %arg7[%c0_91, %c0_92, %c0_93] : memref<1x8x128xf32, #tpu.memory_space<vmem>>, vector<1x8x128xf32>
    %175 = vector.shape_cast %174 : vector<1x8x128xf32> to vector<8x128xf32>
    %176 = vector.shape_cast %173 : vector<8x128xf32> to vector<1x8x128xf32>
    tpu.vector_store %arg7[%c0_91, %c0_92, %c0_93], %176 {strides = array<i32>} : memref<1x8x128xf32, #tpu.memory_space<vmem>>, vector<1x8x128xf32>,
    return
  }
  func.func @transform_0(%arg0: i32, %arg1: i32, %arg2: memref<2x16xi32, #tpu.memory_space<smem>>) -> (i32, i32) {
    %c0_i32 = arith.constant 0 : i32
    %c0_i32_0 = arith.constant 0 : i32
    return %arg0, %c0_i32 : i32, i32
  }
  func.func @transform_1(%arg0: i32, %arg1: i32, %arg2: memref<2x16xi32, #tpu.memory_space<smem>>) -> (i32, i32) {
    %c0_i32 = arith.constant 0 : i32
    %c0_i32_0 = arith.constant 0 : i32
    %c0_i32_1 = arith.constant 0 : i32
    return %c0_i32, %c0_i32_0 : i32, i32
  }
  func.func @transform_2(%arg0: i32, %arg1: i32, %arg2: memref<2x16xi32, #tpu.memory_space<smem>>) -> (i32, i32) {
    %c0_i32 = arith.constant 0 : i32
    %c0_i32_0 = arith.constant 0 : i32
    %c0_i32_1 = arith.constant 0 : i32
    return %c0_i32, %c0_i32_0 : i32, i32
  }
  func.func @transform_4(%arg0: i32, %arg1: i32, %arg2: memref<2x16xi32, #tpu.memory_space<smem>>) -> (i32, i32, i32) {
    %c0_i32 = arith.constant 0 : i32
    %c0_i32_0 = arith.constant 0 : i32
    return %arg1, %arg0, %c0_i32 : i32, i32, i32
  }
}

</mosaic_0001>

<bundles_post_ra>
// kernel: tpu_custom_call.1
= control target key start
LH: loop header
LB: loop body
LE: loop exit
PB: predicated region body
PF: predicated region fallthrough
CT: control target
= control target key end

     0   :  { %s1691_s0 = inlined_call_operand.hbm [shape: s32[2,16], index: 0, kind: input, shape index: {}]   ;;  %s1692_s1 = inlined_call_operand.hbm [shape: f32[16,128], index: 1, kind: input, shape index: {}]   ;;  %s1693_s2 = inlined_call_operand.vmem [shape: f32[1,128], index: 2, kind: input, shape index: {}]   ;;  %s1694_s3 = inlined_call_operand.vmem [shape: f32[1,128], index: 3, kind: input, shape index: {}]   ;;  %s1695_s4 = inlined_call_operand.hbm [shape: f32[1000,128], index: 4, kind: input, shape index: {}]   ;;  %s1696_s5 = inlined_call_operand.hbm [shape: f32[2,16,128], index: 5, kind: output, shape index: {}]  }
   0x1   :  { %1711 = sst [smem:[#allocation51_spill]] %s1692_s1  ;;  %s857_s20 = scalar_lea.hbm %s1691_s0, 32 }
   0x2   :  { %1712 = sst [smem:[#allocation52_spill]] %s1696_s5  ;;  %p858_p0 = scmp.ne.s32.totalorder %s1691_s0, %s857_s20 }
   0x3   :  { %p861_p1 = scmp.lt.u32.totalorder %s857_s20, %s1691_s0 }
   0x5   :  { %p863_p2 = pnand %p861_p1, %p858_p0 }
   0x7   :  { %866 = shalt.err (!%p863_p2)  }
   0x8   :  { %s1231_s25 = smov [#allocation5]  }
   0x9   :  { %11 = dma.hbm_to_smem %s1691_s0, 32, %s1231_s25, [#allocation4] }
   0xa   :  { %1161 = dma.done.wait [#allocation4], 32 }
   0xb   :  { %1162 = vsyncadd [#allocation4], 4294967264 }
   0xc   :  { %13 = sfence }
   0xd   :  { %14 = vsyncpa [#allocation7], 0 }
   0xe   :  { %16 = vsyncpa [#allocation7 + $0x1], 0 }
   0xf   :  { %17 = vsyncpa [#allocation8], 0 }
  0x10   :  { %19 = vsyncpa [#allocation8 + $0x1], 0  ;;  %s1284_s28 = smov 0   ;;  %s1286_s29 = smov 0  }
  0x11   :  { %s1288_s30 = smov 0   ;;  %s1290_s6 = smov 0  }
  0x12   :  { %s1292_s7 = smov 0   ;;  %s1294_s8 = smov 0  }
  0x13   :  { %s1296_s0 = smov 0   ;;  %s1298_s9 = smov 0  }
  0x14   :  { %s1300_s10 = smov 0   ;;  %s1302_s11 = smov 0  }
  0x15   :  { %s1304_s12 = smov 0  }
  0x16 LB: > { %1713 = sst [smem:[#allocation39_spill]] %s1189_s28  ;;  %s647_s13 = sadd.s32 4294967295, %s1229_s12   ;;  %s1229_s12 = sphi %s1304_s12, %s25_s12   ;;  %s1225_s11 = sphi %s1302_s11, %s1750_s11   ;;  %s1221_s10 = sphi %s1300_s10, %s1749_s10   ;;  %s1217_s9 = sphi %s1298_s9, %s1748_s9   ;;  %s1213_s0 = sphi %s1296_s0, %s1747_s0   ;;  %s1209_s8 = sphi %s1294_s8, %s1746_s8   ;;  %s1205_s7 = sphi %s1292_s7, %s1745_s7   ;;  %s1201_s6 = sphi %s1290_s6, %s1744_s6   ;;  %s1197_s30 = sphi %s1288_s30, %s1743_s30   ;;  %s1193_s29 = sphi %s1286_s29, %s1752_s29   ;;  %s1189_s28 = sphi %s1284_s28, %s1751_s28  }
  0x17   : > { %1714 = sst [smem:[#allocation40_spill]] %s1197_s30  ;;  %s648_s14 = sadd.s32 4294967294, %s1229_s12  }
  0x18   : > { %1715 = sst [smem:[#allocation41_spill]] %s1205_s7  ;;  %s34_s15 = sadd.s32 1, %s1221_s10 }
  0x19   : > { %1716 = sst [smem:[#allocation42_spill]] %s1209_s8  ;;  %s37_s16 = sadd.s32 1, %s1225_s11 }
  0x1a   : > { %1717 = sst [smem:[#allocation43_spill]] %s1221_s10  ;;  %p35_p3 = scmp.ge.s32.totalorder %s34_s15, 2 }
  0x1b   : > { %1718 = sst [smem:[#allocation44_spill]] %s1225_s11  ;;  %s44_s17 = sadd.s32 1, %s1209_s8 }
  0x1c   : > { %1719 = sst [smem:[#allocation45_spill]] %s1229_s12  ;;  %p51_p4 = scmp.ne.s32.totalorder %s1209_s8, %s1205_s7 }
  0x1d   : > { %p52_p5 = scmp.eq.s32.totalorder %s1229_s12, 0  ;;  %s1754_s15 = smov (%p35_p3, %s34_s15), 0 }
  0x1e   : > { %1720 = sst [smem:[#allocation46_spill]] %s1754_s15  ;;  %s1756_s16 = smov (!%p35_p3, %s37_s16), %s1225_s11 }
  0x1f   : > { %p1348_p6 = por %p52_p5, %p51_p4  ;;  %p57_p7 = scmp.ne.s32.totalorder %s1205_s7, %s1201_s6 }
  0x20   : > { %p39_p8 = scmp.ge.s32.totalorder %s1756_s16, 2  ;;  %p58_p9 = scmp.eq.s32.totalorder %s647_s13, 0 }
  0x21   : > { %s109_s19 = ssub.s32 %s1221_s10, %s1754_s15  ;;  %s114_s20 = sadd.s32 1, %s1197_s30 }
  0x22   : > { %s1758_s16 = smov (%p39_p8, %s1756_s16), 0  ;;  %p1358_p10 = por %p58_p9, %p57_p7 }
  0x23   : > { %1722 = sst [smem:[#allocation47_spill]] %s1758_s16  ;;  %p124_p11 = scmp.ne.s32.totalorder %s1197_s30, %s1193_s29 }
  0x24   : > { %s41_s22 = ssub.s32 %s1225_s11, %s1758_s16  ;;  %p125_p12 = scmp.eq.s32.totalorder %s647_s13, 3 }
  0x25   : > { %p42_p13 = scmp.eq.s32.totalorder %s41_s22, 0  ;;  %s111_s23 = sor.u32 %s109_s19, %s41_s22 }
  0x26   : > { %p112_p0 = scmp.eq.s32.totalorder %s111_s23, 0  ;;  %p1366_p1 = por %p125_p12, %p124_p11 }
  0x27   : > { %s1371_s25 = scalar_select %p42_p13, %s1209_s8, %s44_s17  }
  0x28   : > { %s1724_s24 = scalar_select %p1366_p1, 1, 0 }
  0x29   : > { %1725 = sst [smem:[#allocation48_spill]] %s1371_s25  ;;  %p130_p2 = scmp.ne.s32.totalorder %s1193_s29, %s1189_s28 }
  0x2a   : > { %s1374_s26 = scalar_select %p112_p0, %s1197_s30, %s114_s20  }
  0x2b   : > { %p131_p3 = scmp.eq.s32.totalorder %s648_s14, 3  ;;  %p756_p4 = scmp.lt.s32.totalorder %s1229_s12, 4 }
  0x2c   : > { %1726 = sst [smem:[#allocation49_spill]] %s1374_s26  ;;  %s157_s6 = sand.u32 1, %s1209_s8  }
  0x2d   : > { %p1379_p5 = por %p131_p3, %p130_p2  ;;  %s651_s13 = sshll.u32 %s157_s6, 3 }
  0x2e   : > { %s652_s19 = sshll.u32 %s1225_s11, 7  ;;  %s1729_s1 = sld [smem:[#allocation51_spill]] }
  0x2f   : > { %s1727_s27 = scalar_select %p1379_p5, 1, 0 }
  0x30   : > { %s161_s17 = scalar_lea.vmem [#allocation6], %s651_s13  ;;  %p1394_p7 = pnand %p756_p4, %p1348_p6 }
  0x31   : > { %1728 = sst [smem:[#allocation50_spill]] %s1727_s27  ;;  %s168_s20 = sshll.u32 %s161_s17, 4  ;;  %s1390_s20 = int_to_ptr.vmem [resolvable:$true] %s168_s20 }
  0x32   : > { %s158_s22 = scalar_lea.sflag [#allocation7], %s157_s6  ;;  %p869_p12 = pneg %p1394_p7 }
  0x34   : > { %s1388_s16 = scalar_lea.hbm %s1729_s1, %s652_s19  ;;  %s872_s18 = scalar_lea.hbm %s1729_s1, 256 }
  0x35   : > { %s867_s19 = scalar_lea.hbm %s1388_s16, 128  ;;  %p873_p6 = scmp.lt.u32.totalorder %s1388_s16, %s1729_s1 }
  0x36   : > { %p868_p11 = scmp.ne.s32.totalorder %s1388_s16, %s867_s19  ;;  %p874_p2 = scmp.lt.u32.totalorder %s872_s18, %s867_s19 }
  0x37   : > { %p876_p4 = scmp.lt.u32.totalorder %s867_s19, %s1388_s16 }
  0x38   : > { %p870_p13 = pnand %p869_p12, %p868_p11  ;;  %p875_p3 = por %p874_p2, %p873_p6 }
  0x3a   : > { %p871_p0 = pneg %p870_p13  ;;  %p877_p8 = por %p876_p4, %p875_p3 }
  0x3c   : > { %p878_p9 = pnand %p877_p8, %p871_p0 }
  0x3e   : > { %881 = shalt.err (!%p878_p9)
}
  0x3f   : > { %s882_s6 = scalar_lea.vmem %s1390_s20, 128  ;;  %s1232_s13 = smov [#allocation6]  }
  0x40   : > { %p883_p11 = scmp.ne.s32.totalorder %s1390_s20, %s882_s6  ;;  %s887_s23 = sshll.u32 %s1232_s13, 4  ;;  %s888_s23 = int_to_ptr.vmem [resolvable:$false] %s887_s23 }
  0x41   : > { %s889_s15 = scalar_lea.vmem %s888_s23, 256  ;;  %p890_p1 = scmp.lt.s32.totalorder %s1390_s20, %s888_s23 }
  0x42   : > { %p885_p13 = pnand %p883_p11, %p869_p12  ;;  %p891_p6 = scmp.lt.s32.totalorder %s889_s15, %s882_s6 }
  0x44   : > { %p886_p5 = pneg %p885_p13  ;;  %p892_p2 = por %p891_p6, %p890_p1 }
  0x46   : > { %p893_p3 = pnand %p892_p2, %p886_p5 }
  0x48   : > { %896 = shalt.err (!%p893_p3)
}
  0x49   : > { %751 = dma.hbm_to_vmem [thread:$0]  (!%p1394_p7), %s1388_s16, 128, %s1390_s20, %s158_s22  }
  0x4a   : > { %p1731_p8 = scmp.lt.s32.totalorder %s1229_s12, 5  ;;  %p1732_p9 = scmp.ge.s32.totalorder %s1229_s12, 1 }
  0x4c   : > { %p174_p12 = pnand %p1732_p9, %p1731_p8 }
  0x4d   : > { %s179_s19 = sand.u32 (!%p174_p12), 1, %s1205_s7  }
  0x4e   : > { %177 = sbr.rel (%p174_p12) target bundleno = 654 (0x28e), region = 32  ;;  %s1430_s18 = sshll.u32 (!%p174_p12), %s179_s19, 3 }
  0x4f   : > { %s180_s17 = scalar_lea.sflag (!%p174_p12), [#allocation7], %s179_s19 }
  0x55   : > { %1164 = dma.done.wait (%p1358_p10), %s180_s17, 128  }
  0x56   : > { %1166 = vsyncadd (%p1358_p10), %s180_s17, 4294967168  ;;  %s1704_s16 = sand.u32 1, %s1193_s29   ;;  %s1439_s20 = sshll.u32 %s1217_s9, 3 }
  0x57   : > { %s1443_s14 = sshll.u32 %s1704_s16, 3  ;;  %s207_s22 = sshra.s32 %s1439_s20, 7 }
  0x58   : > { %s209_s13 = sadd.s32 %s1213_s0, %s207_s22  ;;  %s212_s15 = sand.u32 127, %s1439_s20 }
  0x59   : > { %s657_s23 = sshll.u32 %s209_s13, 7  ;;  %s1233_s17 = smov [#allocation2]  }
  0x5a   : > { %s213_s21 = sadd.s32 %s657_s23, %s212_s15  ;;  %s228_s6 = sshll.u32 %s1233_s17, 4  ;;  %s1450_s6 = int_to_ptr.vmem [resolvable:$true] %s228_s6 }
  0x5b   : > { %s214_s19 = sld [smem:[#allocation5 + %s213_s21]]  ;;  %s232_s1 = sadd.s32 1, %s1439_s20 }
  0x5c   : > { %s233_s11 = sshra.s32 %s232_s1, 7  ;;  %s238_s10 = sand.u32 127, %s232_s1 }
  0x5d   : > { %s235_s25 = sadd.s32 %s1213_s0, %s233_s11  ;;  %s1234_s16 = smov [#allocation2 + $0x1]  }
  0x5e   : > { %s664_s8 = sshll.u32 %s235_s25, 7  ;;  %s1452_s26 = sshll.u32 %s1234_s16, 4  ;;  %s257_s26 = int_to_ptr.vmem [resolvable:$true] %s1452_s26 }
  0x5f   : > { %s239_s7 = sadd.s32 %s664_s8, %s238_s10  ;;  %s260_s13 = sadd.s32 2, %s1439_s20 }
  0x60   : > { %s1454_s22 = sld [smem:[#allocation5 + %s239_s7]]  ;;  %s261_s23 = sshra.s32 %s260_s13, 7 }
  0x61   : > { %p215_p10 = scmp.gt.s32.totalorder %s214_s19, 0  ;;  %p658_p1 = scmp.lt.s32.totalorder %s214_s19, 999 }
  0x62   : > { %s1457_s15 = sand.u32 127, %s260_s13  ;;  %s263_s1 = sadd.s32 %s1213_s0, %s261_s23 }
  0x63   : > { %s1760_s19 = smov (!%p215_p10, %s214_s19), 0  ;;  %s671_s21 = sshll.u32 %s263_s1, 7 }
  0x64   : > { %s1762_s19 = smov (!%p658_p1, %s1760_s19), 999  ;;  %s1467_s30 = scalar_lea.hbm %s1695_s4, 16000 }
  0x65   : > { %s663_s11 = sshll.u32 %s1762_s19, 4 }
  0x66   : > { %s220_s8 = scalar_lea.hbm %s1695_s4, %s663_s11  ;;  %p241_p5 = scmp.gt.s32.totalorder %s1454_s22, 0 }
  0x67   : > { %s897_s10 = scalar_lea.hbm %s220_s8, 16  ;;  %p900_p0 = scmp.lt.u32.totalorder %s220_s8, %s1695_s4 }
  0x68   : > { %p898_p7 = scmp.ne.s32.totalorder %s220_s8, %s897_s10  ;;  %p901_p4 = scmp.lt.u32.totalorder %s1467_s30, %s897_s10 }
  0x69   : > { %p903_p13 = scmp.lt.u32.totalorder %s897_s10, %s220_s8 }
  0x6a   : > { %p902_p11 = por %p901_p4, %p900_p0 }
  0x6c   : > { %p904_p6 = por %p903_p13, %p902_p11 }
  0x6e   : > { %p905_p2 = pnand %p904_p6, %p898_p7 }
  0x70   : > { %908 = shalt.err (!%p905_p2)  }
  0x71   : > { %s909_s19 = scalar_lea.vmem %s1450_s6, 16  ;;  %s1476_s13 = scalar_lea.vmem %s1450_s6, 128 }
  0x72   : > { %p910_p3 = scmp.ne.s32.totalorder %s1450_s6, %s909_s19  ;;  %p914_p8 = scmp.lt.s32.totalorder %s1450_s6, %s1450_s6 }
  0x73   : > { %p915_p9 = scmp.lt.s32.totalorder %s1476_s13, %s909_s19 }
  0x75   : > { %p916_p12 = por %p915_p9, %p914_p8 }
  0x77   : > { %p917_p10 = pnand %p916_p12, %p910_p3 }
  0x79   : > { %920 = shalt.err (!%p917_p10)  }
  0x7a   : > { %231 = dma.hbm_to_vmem [thread:$0]  %s220_s8, 16, %s1450_s6, [#allocation3] }
  0x7b   : > { %s242_s28 = scalar_select %p241_p5, %s1454_s22, 0 }
  0x7c   : > { %p665_p1 = scmp.lt.s32.totalorder %s1454_s22, 999  ;;  %s267_s27 = sadd.s32 %s671_s21, %s1457_s15 }
  0x7d   : > { %s1488_s23 = sld [smem:[#allocation5 + %s267_s27]]  ;;  %s1235_s1 = smov [#allocation2 + $0x2]  }
  0x7e   : > { %s1764_s28 = smov (!%p665_p1, %s242_s28), 999  ;;  %s1490_s11 = sshll.u32 %s1235_s1, 4  ;;  %s285_s11 = int_to_ptr.vmem [resolvable:$true] %s1490_s11 }
  0x7f   : > { %s288_s17 = sadd.s32 3, %s1439_s20  ;;  %s670_s25 = sshll.u32 %s1764_s28, 4 }
  0x80   : > { %s289_s10 = sshra.s32 %s288_s17, 7  ;;  %s246_s19 = scalar_lea.hbm %s1695_s4, %s670_s25 }
  0x81   : > { %s291_s8 = sadd.s32 %s1213_s0, %s289_s10  ;;  %s921_s12 = scalar_lea.hbm %s246_s19, 16 }
  0x82   : > { %p922_p5 = scmp.ne.s32.totalorder %s246_s19, %s921_s12  ;;  %p924_p7 = scmp.lt.u32.totalorder %s246_s19, %s1695_s4 }
  0x83   : > { %p925_p0 = scmp.lt.u32.totalorder %s1467_s30, %s921_s12  ;;  %p927_p11 = scmp.lt.u32.totalorder %s921_s12, %s246_s19 }
  0x85   : > { %p926_p4 = por %p925_p0, %p924_p7 }
  0x87   : > { %p928_p13 = por %p927_p11, %p926_p4 }
  0x89   : > { %p929_p6 = pnand %p928_p13, %p922_p5 }
  0x8b   : > { %932 = shalt.err (!%p929_p6)  }
  0x8c   : > { %s933_s15 = scalar_lea.vmem %s257_s26, 16  ;;  %p938_p3 = scmp.lt.s32.totalorder %s257_s26, %s1450_s6 }
  0x8d   : > { %p934_p2 = scmp.ne.s32.totalorder %s257_s26, %s933_s15  ;;  %p939_p8 = scmp.lt.s32.totalorder %s1476_s13, %s933_s15 }
  0x8f   : > { %p940_p9 = por %p939_p8, %p938_p3 }
  0x91   : > { %p941_p12 = pnand %p940_p9, %p934_p2 }
  0x93   : > { %944 = shalt.err (!%p941_p12)  }
  0x94   : > { %259 = dma.hbm_to_vmem [thread:$0]  %s246_s19, 16, %s257_s26, [#allocation3 + $0x1] }
  0x95   : > { %p269_p10 = scmp.gt.s32.totalorder %s1488_s23, 0  ;;  %p672_p1 = scmp.lt.s32.totalorder %s1488_s23, 999 }
  0x96   : > { %s678_s5 = sshll.u32 %s291_s8, 7  ;;  %s294_s12 = sand.u32 127, %s288_s17 }
  0x97   : > { %s1766_s23 = smov (!%p269_p10, %s1488_s23), 0  ;;  %s295_s21 = sadd.s32 %s678_s5, %s294_s12 }
  0x98   : > { %s1768_s23 = smov (!%p672_p1, %s1766_s23), 999  ;;  %s1507_s28 = sld [smem:[#allocation5 + %s295_s21]] }
  0x99   : > { %s677_s27 = sshll.u32 %s1768_s23, 4  ;;  %s1236_s1 = smov [#allocation2 + $0x3]  }
  0x9a   : > { %s312_s25 = sshll.u32 %s1236_s1, 4  ;;  %s274_s16 = scalar_lea.hbm %s1695_s4, %s677_s27  ;;  %s1522_s25 = int_to_ptr.vmem [resolvable:$true] %s312_s25 }
  0x9b   : > { %s316_s7 = sadd.s32 4, %s1439_s20  ;;  %s945_s19 = scalar_lea.hbm %s274_s16, 16 }
  0x9c   : > { %p946_p5 = scmp.ne.s32.totalorder %s274_s16, %s945_s19  ;;  %p948_p7 = scmp.lt.u32.totalorder %s274_s16, %s1695_s4 }
  0x9d   : > { %p949_p0 = scmp.lt.u32.totalorder %s1467_s30, %s945_s19  ;;  %p951_p11 = scmp.lt.u32.totalorder %s945_s19, %s274_s16 }
  0x9f   : > { %p950_p4 = por %p949_p0, %p948_p7 }
  0xa1   : > { %p952_p13 = por %p951_p11, %p950_p4 }
  0xa3   : > { %p953_p6 = pnand %p952_p13, %p946_p5 }
  0xa5   : > { %956 = shalt.err (!%p953_p6)  }
  0xa6   : > { %s957_s23 = scalar_lea.vmem %s285_s11, 16  ;;  %p962_p3 = scmp.lt.s32.totalorder %s285_s11, %s1450_s6 }
  0xa7   : > { %p958_p2 = scmp.ne.s32.totalorder %s285_s11, %s957_s23  ;;  %p963_p8 = scmp.lt.s32.totalorder %s1476_s13, %s957_s23 }
  0xa9   : > { %p964_p9 = por %p963_p8, %p962_p3 }
  0xab   : > { %p965_p12 = pnand %p964_p9, %p958_p2 }
  0xad   : > { %968 = shalt.err (!%p965_p12)  }
  0xae   : > { %287 = dma.hbm_to_vmem [thread:$0]  %s274_s16, 16, %s285_s11, [#allocation3 + $0x2] }
  0xaf   : > { %s317_s17 = sshra.s32 %s316_s7, 7  ;;  %s322_s8 = sand.u32 127, %s316_s7 }
  0xb0   : > { %s319_s5 = sadd.s32 %s1213_s0, %s317_s17  ;;  %p297_p10 = scmp.gt.s32.totalorder %s1507_s28, 0 }
  0xb1   : > { %p679_p1 = scmp.lt.s32.totalorder %s1507_s28, 999  ;;  %s685_s12 = sshll.u32 %s319_s5, 7 }
  0xb2   : > { %s1770_s28 = smov (!%p297_p10, %s1507_s28), 0  ;;  %s323_s21 = sadd.s32 %s685_s12, %s322_s8 }
  0xb3   : > { %s1237_s27 = smov [#allocation2 + $0x4]   ;;  %s1772_s28 = smov (!%p679_p1, %s1770_s28), 999 }
  0xb4   : > { %s1525_s1 = sshll.u32 %s1237_s27, 4  ;;  %s1527_s11 = sld [smem:[#allocation5 + %s323_s21]]  ;;  %s1547_s1 = int_to_ptr.vmem [resolvable:$true] %s1525_s1 }
  0xb5   : > { %s344_s26 = sadd.s32 5, %s1439_s20  ;;  %s684_s10 = sshll.u32 %s1772_s28, 4 }
  0xb6   : > { %s345_s16 = sshra.s32 %s344_s26, 7  ;;  %s302_s22 = scalar_lea.hbm %s1695_s4, %s684_s10 }
  0xb7   : > { %s347_s15 = sadd.s32 %s1213_s0, %s345_s16  ;;  %s969_s23 = scalar_lea.hbm %s302_s22, 16 }
  0xb8   : > { %p970_p5 = scmp.ne.s32.totalorder %s302_s22, %s969_s23  ;;  %p972_p7 = scmp.lt.u32.totalorder %s302_s22, %s1695_s4 }
  0xb9   : > { %p973_p0 = scmp.lt.u32.totalorder %s1467_s30, %s969_s23  ;;  %p975_p11 = scmp.lt.u32.totalorder %s969_s23, %s302_s22 }
  0xbb   : > { %p974_p4 = por %p973_p0, %p972_p7 }
  0xbd   : > { %p976_p13 = por %p975_p11, %p974_p4 }
  0xbf   : > { %p977_p6 = pnand %p976_p13, %p970_p5 }
  0xc1   : > { %980 = shalt.err (!%p977_p6)  }
  0xc2   : > { %s981_s28 = scalar_lea.vmem %s1522_s25, 16  ;;  %p986_p3 = scmp.lt.s32.totalorder %s1522_s25, %s1450_s6 }
  0xc3   : > { %p982_p2 = scmp.ne.s32.totalorder %s1522_s25, %s981_s28  ;;  %p987_p8 = scmp.lt.s32.totalorder %s1476_s13, %s981_s28 }
  0xc5   : > { %p988_p9 = por %p987_p8, %p986_p3 }
  0xc7   : > { %p989_p12 = pnand %p988_p9, %p982_p2 }
  0xc9   : > { %992 = shalt.err (!%p989_p12)  }
  0xca   : > { %315 = dma.hbm_to_vmem [thread:$0]  %s302_s22, 16, %s1522_s25, [#allocation3 + $0x3] }
  0xcb   : > { %s692_s8 = sshll.u32 %s347_s15, 7  ;;  %s350_s12 = sand.u32 127, %s344_s26 }
  0xcc   : > { %s351_s21 = sadd.s32 %s692_s8, %s350_s12  ;;  %p325_p10 = scmp.gt.s32.totalorder %s1527_s11, 0 }
  0xcd   : > { %p686_p1 = scmp.lt.s32.totalorder %s1527_s11, 999  ;;  %s1549_s27 = sld [smem:[#allocation5 + %s351_s21]] }
  0xce   : > { %s1774_s11 = smov (!%p325_p10, %s1527_s11), 0  ;;  %s1238_s10 = smov [#allocation2 + $0x5]  }
  0xcf   : > { %s1552_s16 = sshll.u32 %s1238_s10, 4  ;;  %s372_s7 = sadd.s32 6, %s1439_s20  ;;  %s369_s16 = int_to_ptr.vmem [resolvable:$true] %s1552_s16 }
  0xd0   : > { %s1776_s11 = smov (!%p686_p1, %s1774_s11), 999  ;;  %s373_s19 = sshra.s32 %s372_s7, 7 }
  0xd1   : > { %s378_s25 = sand.u32 127, %s372_s7  ;;  %s691_s22 = sshll.u32 %s1776_s11, 4 }
  0xd2   : > { %s375_s15 = sadd.s32 %s1213_s0, %s373_s19  ;;  %s330_s17 = scalar_lea.hbm %s1695_s4, %s691_s22 }
  0xd3   : > { %p353_p5 = scmp.gt.s32.totalorder %s1549_s27, 0  ;;  %s993_s5 = scalar_lea.hbm %s330_s17, 16 }
  0xd4   : > { %p994_p7 = scmp.ne.s32.totalorder %s330_s17, %s993_s5  ;;  %p996_p0 = scmp.lt.u32.totalorder %s330_s17, %s1695_s4 }
  0xd5   : > { %p997_p4 = scmp.lt.u32.totalorder %s1467_s30, %s993_s5  ;;  %p999_p13 = scmp.lt.u32.totalorder %s993_s5, %s330_s17 }
  0xd7   : > { %p998_p11 = por %p997_p4, %p996_p0 }
  0xd9   : > { %p1000_p6 = por %p999_p13, %p998_p11 }
  0xdb   : > { %p1001_p2 = pnand %p1000_p6, %p994_p7 }
  0xdd   : > { %1004 = shalt.err (!%p1001_p2)  }
  0xde   : > { %s1005_s11 = scalar_lea.vmem %s1547_s1, 16  ;;  %p1010_p8 = scmp.lt.s32.totalorder %s1547_s1, %s1450_s6 }
  0xdf   : > { %p1006_p3 = scmp.ne.s32.totalorder %s1547_s1, %s1005_s11  ;;  %p1011_p9 = scmp.lt.s32.totalorder %s1476_s13, %s1005_s11 }
  0xe1   : > { %p1012_p12 = por %p1011_p9, %p1010_p8 }
  0xe3   : > { %p1013_p10 = pnand %p1012_p12, %p1006_p3 }
  0xe5   : > { %1016 = shalt.err (!%p1013_p10)  }
  0xe6   : > { %343 = dma.hbm_to_vmem [thread:$0]  %s330_s17, 16, %s1547_s1, [#allocation3 + $0x4] }
  0xe7   : > { %s354_s12 = scalar_select %p353_p5, %s1549_s27, 0 }
  0xe8   : > { %p693_p1 = scmp.lt.s32.totalorder %s1549_s27, 999  ;;  %s699_s21 = sshll.u32 %s375_s15, 7 }
  0xe9   : > { %s379_s10 = sadd.s32 %s699_s21, %s378_s25  ;;  %s400_s5 = sadd.s32 7, %s1439_s20 }
  0xea   : > { %s1778_s12 = smov (!%p693_p1, %s354_s12), 999  ;;  %s1575_s7 = sld [smem:[#allocation5 + %s379_s10]] }
  0xeb   : > { %s698_s19 = sshll.u32 %s1778_s12, 4 }
  0xec   : > { %s358_s23 = scalar_lea.hbm %s1695_s4, %s698_s19 }
  0xed   : > { %s1017_s28 = scalar_lea.hbm %s358_s23, 16  ;;  %p1020_p0 = scmp.lt.u32.totalorder %s358_s23, %s1695_s4 }
  0xee   : > { %p1018_p7 = scmp.ne.s32.totalorder %s358_s23, %s1017_s28  ;;  %p1021_p5 = scmp.lt.u32.totalorder %s1467_s30, %s1017_s28 }
  0xef   : > { %p1023_p11 = scmp.lt.u32.totalorder %s1017_s28, %s358_s23 }
  0xf0   : > { %p1022_p4 = por %p1021_p5, %p1020_p0 }
  0xf2   : > { %p1024_p13 = por %p1023_p11, %p1022_p4 }
  0xf4   : > { %p1025_p6 = pnand %p1024_p13, %p1018_p7 }
  0xf6   : > { %1028 = shalt.err (!%p1025_p6)  }
  0xf7   : > { %s1029_s1 = scalar_lea.vmem %s369_s16, 16  ;;  %p1034_p3 = scmp.lt.s32.totalorder %s369_s16, %s1450_s6 }
  0xf8   : > { %p1030_p2 = scmp.ne.s32.totalorder %s369_s16, %s1029_s1  ;;  %p1035_p8 = scmp.lt.s32.totalorder %s1476_s13, %s1029_s1 }
  0xfa   : > { %p1036_p9 = por %p1035_p8, %p1034_p3 }
  0xfc   : > { %p1037_p12 = pnand %p1036_p9, %p1030_p2 }
  0xfe   : > { %1040 = shalt.err (!%p1037_p12)  }
  0xff   : > { %371 = dma.hbm_to_vmem [thread:$0]  %s358_s23, 16, %s369_s16, [#allocation3 + $0x5] }
 0x100   : > { %s401_s20 = sshra.s32 %s400_s5, 7  ;;  %s406_s25 = sand.u32 127, %s400_s5 }
 0x101   : > { %s403_s27 = sadd.s32 %s1213_s0, %s401_s20  ;;  %p381_p10 = scmp.gt.s32.totalorder %s1575_s7, 0 }
 0x102   : > { %p700_p1 = scmp.lt.s32.totalorder %s1575_s7, 999  ;;  %s1239_s15 = smov [#allocation2 + $0x6]  }
 0x103   : > { %s396_s17 = sshll.u32 %s1239_s15, 4  ;;  %s706_s12 = sshll.u32 %s403_s27, 7  ;;  %s397_s17 = int_to_ptr.vmem [resolvable:$true] %s396_s17 }
 0x104   : > { %s1780_s7 = smov (!%p381_p10, %s1575_s7), 0  ;;  %s407_s21 = sadd.s32 %s706_s12, %s406_s25 }
 0x105   : > { %s1782_s7 = smov (!%p700_p1, %s1780_s7), 999  ;;  %s408_s10 = sld [smem:[#allocation5 + %s407_s21]] }
 0x106   : > { %s705_s19 = sshll.u32 %s1782_s7, 4 }
 0x107   : > { %s386_s26 = scalar_lea.hbm %s1695_s4, %s705_s19 }
 0x108   : > { %s1041_s23 = scalar_lea.hbm %s386_s26, 16  ;;  %p1044_p0 = scmp.lt.u32.totalorder %s386_s26, %s1695_s4 }
 0x109   : > { %p1042_p7 = scmp.ne.s32.totalorder %s386_s26, %s1041_s23  ;;  %p1045_p5 = scmp.lt.u32.totalorder %s1467_s30, %s1041_s23 }
 0x10a   : > { %p1047_p11 = scmp.lt.u32.totalorder %s1041_s23, %s386_s26 }
 0x10b   : > { %p1046_p4 = por %p1045_p5, %p1044_p0 }
 0x10d   : > { %p1048_p13 = por %p1047_p11, %p1046_p4 }
 0x10f   : > { %p1049_p6 = pnand %p1048_p13, %p1042_p7 }
 0x111   : > { %1052 = shalt.err (!%p1049_p6)  }
 0x112   : > { %s1053_s8 = scalar_lea.vmem %s397_s17, 16  ;;  %p1058_p3 = scmp.lt.s32.totalorder %s397_s17, %s1450_s6 }
 0x113   : > { %p1054_p2 = scmp.ne.s32.totalorder %s397_s17, %s1053_s8  ;;  %p1059_p8 = scmp.lt.s32.totalorder %s1476_s13, %s1053_s8 }
 0x115   : > { %p1060_p9 = por %p1059_p8, %p1058_p3 }
 0x117   : > { %p1061_p12 = pnand %p1060_p9, %p1054_p2 }
 0x119   : > { %1064 = shalt.err (!%p1061_p12)  }
 0x11a   : > { %399 = dma.hbm_to_vmem [thread:$0]  %s386_s26, 16, %s397_s17, [#allocation3 + $0x6] }
 0x11b   : > { %p409_p10 = scmp.gt.s32.totalorder %s408_s10, 0  ;;  %p707_p1 = scmp.lt.s32.totalorder %s408_s10, 999 }
 0x11c   : > { %s1240_s7 = smov [#allocation2 + $0x7]  }
 0x11d   : > { %s424_s11 = sshll.u32 %s1240_s7, 4  ;;  %s1784_s10 = smov (!%p409_p10, %s408_s10), 0  ;;  %s425_s11 = int_to_ptr.vmem [resolvable:$true] %s424_s11 }
 0x11e   : > { %s1786_s10 = smov (!%p707_p1, %s1784_s10), 999 }
 0x11f   : > { %s712_s1 = sshll.u32 %s1786_s10, 4 }
 0x120   : > { %s414_s25 = scalar_lea.hbm %s1695_s4, %s712_s1 }
 0x121   : > { %s1065_s15 = scalar_lea.hbm %s414_s25, 16  ;;  %p1068_p0 = scmp.lt.u32.totalorder %s414_s25, %s1695_s4 }
 0x122   : > { %p1066_p7 = scmp.ne.s32.totalorder %s414_s25, %s1065_s15  ;;  %p1069_p5 = scmp.lt.u32.totalorder %s1467_s30, %s1065_s15 }
 0x123   : > { %p1071_p11 = scmp.lt.u32.totalorder %s1065_s15, %s414_s25 }
 0x124   : > { %p1070_p4 = por %p1069_p5, %p1068_p0 }
 0x126   : > { %p1072_p13 = por %p1071_p11, %p1070_p4 }
 0x128   : > { %p1073_p6 = pnand %p1072_p13, %p1066_p7 }
 0x12a   : > { %1076 = shalt.err (!%p1073_p6)  }
 0x12b   : > { %s1077_s17 = scalar_lea.vmem %s425_s11, 16  ;;  %p1082_p3 = scmp.lt.s32.totalorder %s425_s11, %s1450_s6 }
 0x12c   : > { %p1078_p2 = scmp.ne.s32.totalorder %s425_s11, %s1077_s17  ;;  %p1083_p8 = scmp.lt.s32.totalorder %s1476_s13, %s1077_s17 }
 0x12e   : > { %p1084_p9 = por %p1083_p8, %p1082_p3 }
 0x130   : > { %p1085_p12 = pnand %p1084_p9, %p1078_p2 }
 0x132   : > { %1088 = shalt.err (!%p1085_p12)  }
 0x133   : > { %427 = dma.hbm_to_vmem [thread:$0]  %s414_s25, 16, %s425_s11, [#allocation3 + $0x7] }
 0x134   : > { %s205_s10 = scalar_lea.vmem [#allocation9], %s1443_s14 }
 0x135   : > { %1167 = dma.done.wait [#allocation3], 16 }
 0x136   : > { %1168 = vsyncadd [#allocation3], 4294967280 }
 0x137   : > { %1169 = dma.done.wait [#allocation3 + $0x1], 16 }
 0x138   : > { %1170 = vsyncadd [#allocation3 + $0x1], 4294967280 }
 0x139   : > { %1171 = dma.done.wait [#allocation3 + $0x2], 16 }
 0x13a   : > { %1172 = vsyncadd [#allocation3 + $0x2], 4294967280 }
 0x13b   : > { %1173 = dma.done.wait [#allocation3 + $0x3], 16 }
 0x13c   : > { %1174 = vsyncadd [#allocation3 + $0x3], 4294967280 }
 0x13d   : > { %1175 = dma.done.wait [#allocation3 + $0x4], 16 }
 0x13e   : > { %1176 = vsyncadd [#allocation3 + $0x4], 4294967280 }
 0x13f   : > { %1177 = dma.done.wait [#allocation3 + $0x5], 16 }
 0x140   : > { %1178 = vsyncadd [#allocation3 + $0x5], 4294967280 }
 0x141   : > { %1179 = dma.done.wait [#allocation3 + $0x6], 16 }
 0x142   : > { %1180 = vsyncadd [#allocation3 + $0x6], 4294967280 }
 0x143   : > { %1181 = dma.done.wait [#allocation3 + $0x7], 16 }
 0x144   : > { %1182 = vsyncadd [#allocation3 + $0x7], 4294967280  ;;  %v444_v0 = vld [vmem:[#allocation2] sm:$0xff]  ;;  %s1733_s30 = scalar_lea.vmem [#allocation6], %s1430_s18  ;;  %s716_s6 = sshll.u32 %s1213_s0, 1 }
 0x145   : > { %v446_v1 = vld [vmem:[%s1733_s30] sm:$0xff]  ;;  %v445_v2 = vmul.f32 11.313708, %v444_v0  ;;  %s489_s13 = sadd.s32 %s1217_s9, %s716_s6  ;;  %v713_v12 = vld [vmem:[%s1693_s2] ss:$0 sm:$0xff]  ;;  %s493_s23 = sshll.u32 %s205_s10, 4  ;;  %s1627_s23 = int_to_ptr.vmem [resolvable:$true] %s493_s23 }
 0x146   : > { %v714_v14 = vld [vmem:[%s1694_s3] ss:$0 sm:$0xff]  ;;  %s717_s26 = sshll.u32 %s489_s13, 7  ;;  %s1734_s0 = sld [smem:[#allocation52_spill]] }
 0x147   : > { %v447_v3 = vadd.f32 %v446_v1, %v445_v2  ;;  %s1736_s9 = sand.u32 1, %s1193_s29   ;;  %s1089_s11 = scalar_lea.vmem %s1627_s23, 128 }
 0x148   : > { %s478_s7 = scalar_lea.sflag [#allocation8], %s1736_s9  ;;  %p1090_p10 = scmp.ne.s32.totalorder %s1627_s23, %s1089_s11 }
 0x149   : > { %448 = vadd.xlane.f32.xlu0 %v447_v3  ;;  %p1737_p1 = scmp.ne.s32.totalorder %s1724_s24, 0  ;;  %s1241_s20 = smov [#allocation9]  }
 0x14a   : > { %s1093_s27 = sshll.u32 %s1241_s20, 4  ;;  %s1094_s27 = int_to_ptr.vmem [resolvable:$false] %s1093_s27 }
 0x14b   : > { %p1091_p7 = pnand %p1090_p10, %p1737_p1  ;;  %s1095_s25 = scalar_lea.vmem %s1094_s27, 256 }
 0x14c   : > { %s1735_s1 = smov %s1734_s0  ;;  %s1625_s8 = scalar_lea.hbm %s1734_s0, %s717_s26 }
 0x14d   : > { %p1092_p0 = pneg %p1091_p7  ;;  %p1096_p5 = scmp.lt.s32.totalorder %s1627_s23, %s1094_s27 }
 0x14e   : > { %p1097_p4 = scmp.lt.s32.totalorder %s1095_s25, %s1089_s11 }
 0x150   : > { %p1098_p11 = por %p1097_p4, %p1096_p5 }
 0x152   : > { %p1099_p13 = pnand %p1098_p11, %p1092_p0 }
 0x1d6   : > { %v449_v4 = vpop.xlane.xlu0 %448 }
 0x1d7   : > { %v451_v5 = vmul.f32 0.0078125, %v449_v4 }
 0x1d9   : > { %v452_v6 = vsub.f32 %v447_v3, %v451_v5 }
 0x1db   : > { %v453_v7 = vmul.f32 %v452_v6, %v452_v6 }
 0x1dd   : > { %454 = vadd.xlane.f32.xlu0 %v453_v7 }
 0x26a   : > { %v455_v8 = vpop.xlane.xlu0 %454 }
 0x26b   : > { %v456_v9 = vmul.f32 0.0078125, %v455_v8 }
 0x26d   : > { %v457_v10 = vadd.f32 1e-05, %v456_v9 }
 0x26f   : > { %855 = vrsqrt.f32 %v457_v10 }
 0x279   : > { %v856_v11 = vpop.eup %855 }
 0x27a   : > { %v459_v13 = vmul.f32 %v856_v11, %v452_v6 }
 0x27c   : > { %v467_v15 = vmul.f32 %v713_v12, %v459_v13 }
 0x27e   : > { %v475_v16 = vadd.f32 %v714_v14, %v467_v15 }
 0x280   : > { %476 = vst [vmem:[%s205_s10] sm:$0xff] %v475_v16 }
 0x281   : > { %1102 = shalt.err (!%p1099_p13)
}
 0x282   : > { %s1103_s14 = scalar_lea.hbm %s1625_s8, 128  ;;  %s1107_s21 = scalar_lea.hbm %s1735_s1, 512 }
 0x283   : > { %p1104_p6 = scmp.ne.s32.totalorder %s1625_s8, %s1103_s14  ;;  %p1108_p8 = scmp.lt.u32.totalorder %s1625_s8, %s1735_s1 }
 0x284   : > { %p1109_p9 = scmp.lt.u32.totalorder %s1107_s21, %s1103_s14  ;;  %p1111_p10 = scmp.lt.u32.totalorder %s1103_s14, %s1625_s8 }
 0x285   : > { %p1105_p2 = pnand %p1104_p6, %p1737_p1 }
 0x286   : > { %p1110_p12 = por %p1109_p9, %p1108_p8 }
 0x287   : > { %p1106_p3 = pneg %p1105_p2 }
 0x288   : > { %p1112_p7 = por %p1111_p10, %p1110_p12 }
 0x28a   : > { %p1113_p0 = pnand %p1112_p7, %p1106_p3 }
 0x28c   : > { %1116 = shalt.err (!%p1113_p0)
}
 0x28d   : > { %746 = dma.vmem_to_hbm [thread:$0]  (%p1737_p1), %s1627_s23, 128, %s1625_s8, %s478_s7  }
 0x28e PF: > { %s1738_s30 = sld [smem:[#allocation45_spill]]  ;;  %s1739_s6 = sld [smem:[#allocation39_spill]] }
 0x28f   : > { %s1740_s13 = sld [smem:[#allocation50_spill]] }
 0x294   : > { %p757_p5 = scmp.ge.s32.totalorder %s1738_s30, 2  ;;  %s505_s18 = sand.u32 1, %s1739_s6  }
 0x295   : > { %p1741_p4 = scmp.ne.s32.totalorder %s1740_s13, 0  ;;  %s506_s19 = scalar_lea.sflag [#allocation8], %s505_s18 }
 0x297   : > { %p753_p11 = pnand %p757_p5, %p1741_p4 }
 0x299   : > { %1184 = dma.done.wait (!%p753_p11), %s506_s19, 128  }
 0x29a   : > { %1186 = vsyncadd (!%p753_p11), %s506_s19, 4294967168  ;;  %s25_s12 = sadd.s32 1, %s1738_s30   ;;  %s1742_s16 = sld [smem:[#allocation40_spill]] }
 0x29b   : > { %p22_p13 = scmp.ge.s32.totalorder %s25_s12, 6   ;;  %s1743_s30 = sld [smem:[#allocation49_spill]] }
 0x29c   : > { %s1744_s6 = sld [smem:[#allocation41_spill]]  ;;  %s1745_s7 = sld [smem:[#allocation42_spill]] }
 0x29d   : > { %s1746_s8 = sld [smem:[#allocation48_spill]]  ;;  %s1747_s0 = sld [smem:[#allocation43_spill]] }
 0x29e   : > { %s1748_s9 = sld [smem:[#allocation44_spill]]  ;;  %s1749_s10 = sld [smem:[#allocation46_spill]] }
 0x29f   : > { %s1750_s11 = sld [smem:[#allocation47_spill]]  ;;  %s1751_s28 = smov %s1193_s29 }
 0x2a0   : > { %s1752_s29 = smov %s1742_s16  ;;  %24 = sbr.rel (!%p22_p13) target bundleno = 22 (0x16), region = 138 }
 0x2a7   :  { %511 = vsyncpa [#allocation7], 1 }
 0x2a8   :  { %513 = vsyncpa [#allocation7 + $0x1], 1 }
 0x2a9   :  { %514 = vsyncpa [#allocation8], 1 }
 0x2aa   :  { %516 = vsyncpa [#allocation8 + $0x1], 1 }
 0x2ab   :  { %517 = vsyncmov [#allocation3] }
 0x2ae   :  { %s518_s24 = vpop.sfrf %517 }
 0x2af   :  { %p720_p1 = scmp.ne.s32.totalorder %s518_s24, 0 }
 0x2b1   :  { %522 = shalt.err (%p720_p1)  }
 0x2b2   :  { %524 = vsyncmov [#allocation3 + $0x1] }
 0x2b5   :  { %s525_s22 = vpop.sfrf %524 }
 0x2b6   :  { %p721_p6 = scmp.ne.s32.totalorder %s525_s22, 0 }
 0x2b8   :  { %529 = shalt.err (%p721_p6)  }
 0x2b9   :  { %531 = vsyncmov [#allocation3 + $0x2] }
 0x2bc   :  { %s532_s26 = vpop.sfrf %531 }
 0x2bd   :  { %p722_p2 = scmp.ne.s32.totalorder %s532_s26, 0 }
 0x2bf   :  { %536 = shalt.err (%p722_p2)  }
 0x2c0   :  { %538 = vsyncmov [#allocation3 + $0x3] }
 0x2c3   :  { %s539_s23 = vpop.sfrf %538 }
 0x2c4   :  { %p723_p3 = scmp.ne.s32.totalorder %s539_s23, 0 }
 0x2c6   :  { %543 = shalt.err (%p723_p3)  }
 0x2c7   :  { %545 = vsyncmov [#allocation3 + $0x4] }
 0x2ca   :  { %s546_s2 = vpop.sfrf %545 }
 0x2cb   :  { %p724_p8 = scmp.ne.s32.totalorder %s546_s2, 0 }
 0x2cd   :  { %550 = shalt.err (%p724_p8)  }
 0x2ce   :  { %552 = vsyncmov [#allocation3 + $0x5] }
 0x2d1   :  { %s553_s3 = vpop.sfrf %552 }
 0x2d2   :  { %p725_p9 = scmp.ne.s32.totalorder %s553_s3, 0 }
 0x2d4   :  { %557 = shalt.err (%p725_p9)  }
 0x2d5   :  { %559 = vsyncmov [#allocation3 + $0x6] }
 0x2d8   :  { %s560_s4 = vpop.sfrf %559 }
 0x2d9   :  { %p726_p12 = scmp.ne.s32.totalorder %s560_s4, 0 }
 0x2db   :  { %564 = shalt.err (%p726_p12)  }
 0x2dc   :  { %566 = vsyncmov [#allocation3 + $0x7] }
 0x2df   :  { %s567_s29 = vpop.sfrf %566 }
 0x2e0   :  { %p727_p10 = scmp.ne.s32.totalorder %s567_s29, 0 }
 0x2e2   :  { %571 = shalt.err (%p727_p10)  }

</bundles_post_ra>
